<compile_context>
chip_gen: v7x
topology: tpu7x:2x2x1
jax: 0.10.0
libtpu: 0.0.40
codegen_flags: <defaults>
</compile_context>

<pallas_src>
import jax
import jax.numpy as jnp
from jax.experimental import pallas as pl
from jax.experimental.pallas import tpu as pltpu


# ----------------------------- small helpers -------------------------------
def _cdiv(a, b):
    return (a + b - 1) // b


def _round_up(x, m):
    return _cdiv(x, m) * m


def _vmem_capacity_bytes():
    """Physical VMEM of the current chip; conservative fallback = v7x (64 MiB)."""
    try:
        cap = getattr(pltpu.get_tpu_info(), "vmem_capacity_bytes", None)
        if cap:
            return int(cap)
    except Exception:
        pass
    return 64 * 1024 * 1024


def _pick_tile_b(B, C, n_inputs, itemsize, peak_budget_bytes, prefer_even_tiles):
    """Largest multiple-of-8 batch tile whose VMEM footprint fits the budget.

    Footprint model per grid step (temp-aware, per the review):
      inputs (double-buffered):        2 * n * tile_b * C * itemsize
      worst-case f32 temps, all
      streams live simultaneously:     3 * n * tile_b * C * 4
    """
    row_bytes = C * (2 * n_inputs * itemsize + 3 * n_inputs * 4)
    max_rows = max(8, (peak_budget_bytes // max(row_bytes, 1)) // 8 * 8)
    b_pad = _round_up(B, 8)
    tile_b = min(max_rows, b_pad)
    num_tiles = _cdiv(B, tile_b)
    if prefer_even_tiles and num_tiles % 2 == 1 and b_pad > 8:
        # v7x: make the parallel axis split evenly across the 2 TensorCores.
        num_tiles += 1
    # Balance the tiles (smallest multiple-of-8 tile giving this tile count).
    tile_b = min(tile_b, max(8, _round_up(_cdiv(b_pad, num_tiles), 8)))
    return tile_b


# ------------------------------ the kernel ---------------------------------
def _make_ls_ce_kernel(num_inputs, weights, smoothing, confidence,
                       tile_b, batch, need_mask):
    """Kernel over one batch tile: fused weighted label-smoothing CE partials.

    Refs: (tgt_ref, x_ref_0[, x_ref_1, ...], out_ref)
      tgt_ref : (padded_B, 1) int32, RESIDENT (constant block index)
      x_ref_k : (tile_b, C) logits (any float dtype; upcast to f32 in-kernel)
      out_ref : (1, 1, 1) f32 partial sum for this tile
    """

    def kernel(tgt_ref, *refs):
        x_refs = refs[:num_inputs]
        out_ref = refs[num_inputs]

        i = pl.program_id(0)
        start = pl.multiple_of(i * tile_b, 8)
        tgt = tgt_ref[pl.ds(start, tile_b), :]               # (tile_b, 1) int32
        C = x_refs[0].shape[-1]

        # One-hot compare is computed ONCE and shared by main + aux streams.
        cls = jax.lax.broadcasted_iota(jnp.int32, (tile_b, C), 1)
        onehot = cls == tgt                                  # (tile_b, C) bool

        if need_mask:
            local = jax.lax.broadcasted_iota(jnp.int32, (tile_b, 1), 0)
            valid = (i * tile_b + local) < batch             # (tile_b, 1) bool

        total = jnp.float32(0.0)
        for x_ref, w in zip(x_refs, weights):
            x = x_ref[...].astype(jnp.float32)               # (tile_b, C)
            if need_mask:
                x = jnp.where(valid, x, 0.0)                 # kill edge-block garbage
            # log_softmax-free algebra:
            #   per_ex = (m + lse) - conf * x[t] - s * mean_c(x)
            m = jnp.max(x, axis=-1, keepdims=True)           # (tile_b, 1)
            lse = jnp.log(jnp.sum(jnp.exp(x - m), axis=-1, keepdims=True))
            x_t = jnp.sum(jnp.where(onehot, x, 0.0), axis=-1, keepdims=True)
            per_ex = (m + lse) - jnp.float32(confidence) * x_t
            if smoothing != 0.0:
                x_mean = jnp.sum(x, axis=-1, keepdims=True) * jnp.float32(1.0 / C)
                per_ex = per_ex - jnp.float32(smoothing) * x_mean
            if need_mask:
                per_ex = jnp.where(valid, per_ex, 0.0)
            total = total + jnp.float32(w) * jnp.sum(per_ex)

        out_ref[...] = jnp.reshape(total, (1, 1, 1))

    return kernel


# ------------------------------ the wrapper --------------------------------
def _fused_label_smoothing_ce(logits_list, weights, targets, smoothing,
                              tile_b=None):
    """sum_k weights[k] * mean_b[(1-s)*NLL(x_k,t) + s*(-mean_c log_softmax(x_k))]."""
    logits_list = list(logits_list)
    B, C = logits_list[0].shape
    for lg in logits_list:
        assert lg.shape == (B, C), "all logits must share shape (B, C)"
    n = len(logits_list)
    confidence = 1.0 - float(smoothing)
    itemsize = jnp.dtype(logits_list[0].dtype).itemsize

    # Chip-aware VMEM budgeting.
    vmem_cap = _vmem_capacity_bytes()
    if vmem_cap >= 96 * 1024 * 1024:          # v5e / v6e: 128 MiB physical
        vmem_limit = 64 * 1024 * 1024
        prefer_even_tiles = False
    else:                                      # v7x: 64 MiB per TensorCore
        vmem_limit = 48 * 1024 * 1024
        prefer_even_tiles = True
    peak_budget = (vmem_limit * 3) // 4        # headroom for targets/partials/scratch

    if tile_b is None:
        tile_b = _pick_tile_b(B, C, n, itemsize, peak_budget, prefer_even_tiles)
    tile_b = max(8, (int(tile_b) // 8) * 8)

    num_tiles = _cdiv(B, tile_b)
    padded_b = num_tiles * tile_b
    need_mask = padded_b != B

    # Targets: resident (padded_B, 1) int32 input; pad (tiny) so in-kernel
    # pl.ds slicing never leaves the allocation.  Logits are NOT padded.
    tgt2 = targets.astype(jnp.int32).reshape(B, 1)
    if padded_b != B:
        tgt2 = jnp.pad(tgt2, ((0, padded_b - B), (0, 0)))

    kernel = _make_ls_ce_kernel(
        n, tuple(float(w) for w in weights), float(smoothing), float(confidence),
        tile_b, B, need_mask)

    in_specs = [pl.BlockSpec((padded_b, 1), lambda i: (0, 0))]   # resident targets
    in_specs += [pl.BlockSpec((tile_b, C), lambda i: (i, 0)) for _ in range(n)]

    # Parallel partial sums: one (1,1,1) output block per grid step -> no
    # cross-iteration accumulator, "parallel" axis is megacore-shardable.
    partials = pl.pallas_call(
        kernel,
        out_shape=jax.ShapeDtypeStruct((num_tiles, 1, 1), jnp.float32),
        grid_spec=pltpu.PrefetchScalarGridSpec(
            num_scalar_prefetch=0,
            grid=(num_tiles,),
            in_specs=in_specs,
            out_specs=pl.BlockSpec((1, 1, 1), lambda i: (i, 0, 0)),
        ),
        compiler_params=pltpu.CompilerParams(
            dimension_semantics=("parallel",),
            vmem_limit_bytes=vmem_limit,
        ),
    )(tgt2, *logits_list)

    return jnp.sum(partials) * jnp.float32(1.0 / B)


def label_smoothing_cross_entropy(logits, targets, smoothing=0.1, tile_b=None):
    """Mean_b[ (1-s) * NLL(x, t) + s * (-mean_c log_softmax(x)) ]."""
    return _fused_label_smoothing_ce([logits], [1.0], targets, smoothing, tile_b)


def inception_v3_loss(inputs, target, smoothing=0.1, tile_b=None):
    """Equivalent of InceptionV3Loss.forward.

    `inputs` may be a tuple (main_logits, aux_logits) or a single logits array.
    With smoothing == 0.0 the same kernel reduces to plain CrossEntropyLoss.
    Perf note: pass bf16 logits straight from the producing layer when
    possible (kernel upcasts in VMEM); do not add a wrapper-side cast.
    """
    if isinstance(inputs, tuple):
        main_output, aux_output = inputs
        # Fused: one kernel scans both logits streams and emits
        # main_loss + 0.4 * aux_loss directly.
        return _fused_label_smoothing_ce(
            [main_output, aux_output], [1.0, 0.4], target, smoothing, tile_b)
    return _fused_label_smoothing_ce([inputs], [1.0], target, smoothing, tile_b)


# ---------------- pure-JAX reference (for verification only) ----------------
def _ref_ls_ce(x, t, smoothing=0.1):
    logp = jax.nn.log_softmax(x.astype(jnp.float32), axis=-1)
    nll = -jnp.take_along_axis(logp, t[:, None], axis=-1)[:, 0]
    smooth = -jnp.mean(logp, axis=-1)
    return jnp.mean((1.0 - smoothing) * nll + smoothing * smooth)


def _ref_inception_loss(inputs, t, smoothing=0.1):
    main, aux = inputs
    return _ref_ls_ce(main, t, smoothing) + 0.4 * _ref_ls_ce(aux, t, smoothing)


if __name__ == "__main__":
    key = jax.random.PRNGKey(0)
    k1, k2, k3, k4, k5, k6, k7 = jax.random.split(key, 7)

    # --- small test: batch=8, num_classes=32 (tuple + plain-CE paths) ---
    B, C = 8, 32
    main_logits = jax.random.normal(k1, (B, C), dtype=jnp.float32)
    aux_logits = jax.random.normal(k2, (B, C), dtype=jnp.float32)
    targets = jax.random.randint(k3, (B,), 0, C, dtype=jnp.int32)

    loss = jax.block_until_ready(
        inception_v3_loss((main_logits, aux_logits), targets, smoothing=0.1))
    ref = _ref_inception_loss((main_logits, aux_logits), targets, smoothing=0.1)
    assert jnp.allclose(loss, ref, atol=1e-5, rtol=1e-4), (loss, ref)

    plain = jax.block_until_ready(
        inception_v3_loss(main_logits, targets, smoothing=0.0))
    plain_ref = _ref_ls_ce(main_logits, targets, smoothing=0.0)
    assert jnp.allclose(plain, plain_ref, atol=1e-5, rtol=1e-4), (plain, plain_ref)

    # --- InceptionV3-like class count (C=1000, not a multiple of 128); force a
    # multi-step grid (tile_b=8 -> 4 tiles) to exercise resident-target slicing
    # and parallel partial sums ---
    B2, C2 = 32, 1000
    m2 = jax.random.normal(k4, (B2, C2), dtype=jnp.float32)
    a2 = jax.random.normal(k5, (B2, C2), dtype=jnp.float32)
    t2 = jax.random.randint(k6, (B2,), 0, C2, dtype=jnp.int32)
    loss2 = jax.block_until_ready(
        inception_v3_loss((m2, a2), t2, smoothing=0.1, tile_b=8))
    ref2 = _ref_inception_loss((m2, a2), t2, smoothing=0.1)
    assert jnp.allclose(loss2, ref2, atol=1e-4, rtol=1e-4), (loss2, ref2)

    # --- auto-tiled path on the same data (single large tile) ---
    loss2b = jax.block_until_ready(inception_v3_loss((m2, a2), t2, smoothing=0.1))
    assert jnp.allclose(loss2b, ref2, atol=1e-4, rtol=1e-4), (loss2b, ref2)

    # --- batch NOT a multiple of 8: exercises in-kernel edge-row masking ---
    B3 = 20
    m3 = m2[:B3]
    a3 = a2[:B3]
    t3 = t2[:B3]
    loss3 = jax.block_until_ready(inception_v3_loss((m3, a3), t3, smoothing=0.1))
    ref3 = _ref_inception_loss((m3, a3), t3, smoothing=0.1)
    assert jnp.allclose(loss3, ref3, atol=1e-4, rtol=1e-4), (loss3, ref3)

    # --- bf16 logits from the "producer" (kernel upcasts in VMEM) ---
    m4 = m2.astype(jnp.bfloat16)
    a4 = a2.astype(jnp.bfloat16)
    loss4 = jax.block_until_ready(inception_v3_loss((m4, a4), t2, smoothing=0.1))
    ref4 = _ref_inception_loss((m4, a4), t2, smoothing=0.1)
    assert jnp.allclose(loss4, ref4, atol=1e-3, rtol=1e-3), (loss4, ref4)

    print("KERNEL_OK")
</pallas_src>

<mosaic_0001>
module attributes {stable_mosaic.version = 11 : i64} {
  func.func @kernel(%arg0: i32, %arg1: memref<8x1xi32, #tpu.memory_space<vmem>>, %arg2: memref<8x32xf32, #tpu.memory_space<vmem>>, %arg3: memref<8x32xf32, #tpu.memory_space<vmem>>, %arg4: memref<1x1x1xf32, #tpu.memory_space<vmem>>) attributes {dimension_semantics = [#tpu.dimension_semantics<parallel>], iteration_bounds = array<i64: 1>, scalar_prefetch = 0 : i64, scratch_operands = 0 : i64, tpu.core_type = #tpu.core_type<tc>, window_params = [{pipeline_mode = #tpu.pipeline_mode<synchronous>, transform_indices = @transform_0, window_bounds = array<i64: 8, 1>}, {transform_indices = @transform_1, window_bounds = array<i64: 8, 32>}, {transform_indices = @transform_2, window_bounds = array<i64: 8, 32>}, {transform_indices = @transform_3, window_bounds = array<i64: 1, 1, 1>}]} {
    %c8_i32 = arith.constant 8 : i32
    %0 = arith.muli %arg0, %c8_i32 : i32
    %1 = tpu.assume_multiple %0, 8 : i32
    %2 = arith.index_cast %1 : i32 to index
    %c0 = arith.constant 0 : index
    %3 = vector.load %arg1[%2, %c0] : memref<8x1xi32, #tpu.memory_space<vmem>>, vector<8x1xi32>
    %4 = tpu.iota {dimensions = array<i32: 1>} : vector<8x32xi32>
    %5 = vector.broadcast %3 : vector<8x1xi32> to vector<8x32xi32>
    %6 = arith.cmpi eq, %4, %5 : vector<8x32xi32>
    %c0_0 = arith.constant 0 : index
    %c0_1 = arith.constant 0 : index
    %7 = vector.load %arg2[%c0_0, %c0_1] : memref<8x32xf32, #tpu.memory_space<vmem>>, vector<8x32xf32>
    %cst = arith.constant dense<0xFF800000> : vector<8xf32>
    %8 = vector.multi_reduction <maximumf>, %7, %cst [1] : vector<8x32xf32> to vector<8xf32>
    %9 = vector.shape_cast %8 : vector<8xf32> to vector<8x1xf32>
    %10 = vector.broadcast %9 : vector<8x1xf32> to vector<8x32xf32>
    %11 = arith.subf %7, %10 : vector<8x32xf32>
    %12 = math.exp %11 : vector<8x32xf32>
    %cst_2 = arith.constant dense<0.000000e+00> : vector<8xf32>
    %13 = vector.multi_reduction <add>, %12, %cst_2 [1] : vector<8x32xf32> to vector<8xf32>
    %14 = vector.shape_cast %13 : vector<8xf32> to vector<8x1xf32>
    %15 = math.log %14 : vector<8x1xf32>
    %cst_3 = arith.constant 0.000000e+00 : f32
    %16 = vector.broadcast %cst_3 : f32 to vector<8x32xf32>
    %17 = arith.select %6, %7, %16 : vector<8x32xi1>, vector<8x32xf32>
    %cst_4 = arith.constant dense<0.000000e+00> : vector<8xf32>
    %18 = vector.multi_reduction <add>, %17, %cst_4 [1] : vector<8x32xf32> to vector<8xf32>
    %19 = vector.shape_cast %18 : vector<8xf32> to vector<8x1xf32>
    %20 = arith.addf %9, %15 : vector<8x1xf32>
    %cst_5 = arith.constant 0.899999976 : f32
    %21 = vector.broadcast %cst_5 : f32 to vector<8x1xf32>
    %22 = arith.mulf %21, %19 : vector<8x1xf32>
    %23 = arith.subf %20, %22 : vector<8x1xf32>
    %cst_6 = arith.constant dense<0.000000e+00> : vector<8xf32>
    %24 = vector.multi_reduction <add>, %7, %cst_6 [1] : vector<8x32xf32> to vector<8xf32>
    %25 = vector.shape_cast %24 : vector<8xf32> to vector<8x1xf32>
    %cst_7 = arith.constant 3.125000e-02 : f32
    %26 = vector.broadcast %cst_7 : f32 to vector<8x1xf32>
    %27 = arith.mulf %25, %26 : vector<8x1xf32>
    %cst_8 = arith.constant 1.000000e-01 : f32
    %28 = vector.broadcast %cst_8 : f32 to vector<8x1xf32>
    %29 = arith.mulf %28, %27 : vector<8x1xf32>
    %30 = arith.subf %23, %29 : vector<8x1xf32>
    %31 = vector.shape_cast %30 : vector<8x1xf32> to vector<1x8x1xf32>
    %cst_9 = arith.constant dense<0.000000e+00> : vector<1xf32>
    %32 = vector.multi_reduction <add>, %31, %cst_9 [1, 2] : vector<1x8x1xf32> to vector<1xf32>
    %33 = vector.shape_cast %32 : vector<1xf32> to vector<1x1x1xf32>
    %34 = vector.extract %33[0, 0, 0] : f32 from vector<1x1x1xf32>
    %cst_10 = arith.constant 1.000000e+00 : f32
    %35 = arith.mulf %cst_10, %34 : f32
    %cst_11 = arith.constant 0.000000e+00 : f32
    %36 = arith.addf %cst_11, %35 : f32
    %c0_12 = arith.constant 0 : index
    %c0_13 = arith.constant 0 : index
    %37 = vector.load %arg3[%c0_12, %c0_13] : memref<8x32xf32, #tpu.memory_space<vmem>>, vector<8x32xf32>
    %cst_14 = arith.constant dense<0xFF800000> : vector<8xf32>
    %38 = vector.multi_reduction <maximumf>, %37, %cst_14 [1] : vector<8x32xf32> to vector<8xf32>
    %39 = vector.shape_cast %38 : vector<8xf32> to vector<8x1xf32>
    %40 = vector.broadcast %39 : vector<8x1xf32> to vector<8x32xf32>
    %41 = arith.subf %37, %40 : vector<8x32xf32>
    %42 = math.exp %41 : vector<8x32xf32>
    %cst_15 = arith.constant dense<0.000000e+00> : vector<8xf32>
    %43 = vector.multi_reduction <add>, %42, %cst_15 [1] : vector<8x32xf32> to vector<8xf32>
    %44 = vector.shape_cast %43 : vector<8xf32> to vector<8x1xf32>
    %45 = math.log %44 : vector<8x1xf32>
    %cst_16 = arith.constant 0.000000e+00 : f32
    %46 = vector.broadcast %cst_16 : f32 to vector<8x32xf32>
    %47 = arith.select %6, %37, %46 : vector<8x32xi1>, vector<8x32xf32>
    %cst_17 = arith.constant dense<0.000000e+00> : vector<8xf32>
    %48 = vector.multi_reduction <add>, %47, %cst_17 [1] : vector<8x32xf32> to vector<8xf32>
    %49 = vector.shape_cast %48 : vector<8xf32> to vector<8x1xf32>
    %50 = arith.addf %39, %45 : vector<8x1xf32>
    %cst_18 = arith.constant 0.899999976 : f32
    %51 = vector.broadcast %cst_18 : f32 to vector<8x1xf32>
    %52 = arith.mulf %51, %49 : vector<8x1xf32>
    %53 = arith.subf %50, %52 : vector<8x1xf32>
    %cst_19 = arith.constant dense<0.000000e+00> : vector<8xf32>
    %54 = vector.multi_reduction <add>, %37, %cst_19 [1] : vector<8x32xf32> to vector<8xf32>
    %55 = vector.shape_cast %54 : vector<8xf32> to vector<8x1xf32>
    %cst_20 = arith.constant 3.125000e-02 : f32
    %56 = vector.broadcast %cst_20 : f32 to vector<8x1xf32>
    %57 = arith.mulf %55, %56 : vector<8x1xf32>
    %cst_21 = arith.constant 1.000000e-01 : f32
    %58 = vector.broadcast %cst_21 : f32 to vector<8x1xf32>
    %59 = arith.mulf %58, %57 : vector<8x1xf32>
    %60 = arith.subf %53, %59 : vector<8x1xf32>
    %61 = vector.shape_cast %60 : vector<8x1xf32> to vector<1x8x1xf32>
    %cst_22 = arith.constant dense<0.000000e+00> : vector<1xf32>
    %62 = vector.multi_reduction <add>, %61, %cst_22 [1, 2] : vector<1x8x1xf32> to vector<1xf32>
    %63 = vector.shape_cast %62 : vector<1xf32> to vector<1x1x1xf32>
    %64 = vector.extract %63[0, 0, 0] : f32 from vector<1x1x1xf32>
    %cst_23 = arith.constant 4.000000e-01 : f32
    %65 = arith.mulf %cst_23, %64 : f32
    %66 = arith.addf %36, %65 : f32
    %67 = vector.broadcast %66 : f32 to vector<1x1x1xf32>
    %c0_24 = arith.constant 0 : index
    %c0_25 = arith.constant 0 : index
    %c0_26 = arith.constant 0 : index
    %68 = vector.load %arg4[%c0_24, %c0_25, %c0_26] : memref<1x1x1xf32, #tpu.memory_space<vmem>>, vector<1x1x1xf32>
    tpu.vector_store %arg4[%c0_24, %c0_25, %c0_26], %67 {strides = array<i32>} : memref<1x1x1xf32, #tpu.memory_space<vmem>>, vector<1x1x1xf32>,
    return
  }
  func.func @transform_0(%arg0: i32) -> (i32, i32) {
    %c0_i32 = arith.constant 0 : i32
    %c0_i32_0 = arith.constant 0 : i32
    %c0_i32_1 = arith.constant 0 : i32
    return %c0_i32, %c0_i32_0 : i32, i32
  }
  func.func @transform_1(%arg0: i32) -> (i32, i32) {
    %c0_i32 = arith.constant 0 : i32
    %c0_i32_0 = arith.constant 0 : i32
    return %arg0, %c0_i32 : i32, i32
  }
  func.func @transform_2(%arg0: i32) -> (i32, i32) {
    %c0_i32 = arith.constant 0 : i32
    %c0_i32_0 = arith.constant 0 : i32
    return %arg0, %c0_i32 : i32, i32
  }
  func.func @transform_3(%arg0: i32) -> (i32, i32, i32) {
    %c0_i32 = arith.constant 0 : i32
    %c0_i32_0 = arith.constant 0 : i32
    %c0_i32_1 = arith.constant 0 : i32
    return %arg0, %c0_i32, %c0_i32_0 : i32, i32, i32
  }
}

</mosaic_0001>

<bundles_post_ra>
// kernel: tpu_custom_call.1
= control target key start
LH: loop header
LB: loop body
LE: loop exit
PB: predicated region body
PF: predicated region fallthrough
CT: control target
= control target key end

     0   :  { %vm25_vm0 = vcmask 261120   ;;  %v156_v4 = vmov 0   ;;  %s207_s0 = inlined_call_operand.vmem [shape: s32[8,1], index: 0, kind: input, shape index: {}]   ;;  %s208_s1 = inlined_call_operand.vmem [shape: f32[8,32], index: 1, kind: input, shape index: {}]   ;;  %s209_s2 = inlined_call_operand.vmem [shape: f32[8,32], index: 2, kind: input, shape index: {}]   ;;  %s210_s3 = inlined_call_operand.hbm [shape: f32[1,1,1], index: 3, kind: output, shape index: {}]  }
   0x1   :  { %v24_v0 = vld [vmem:[%s208_s1] sm:$0xff]  ;;  %122 = vset.pattern.permute.xlu1 %v156_v4  ;;  %123 = vset.pattern.permute.xlu0 %v156_v4 }
   0x2   :  { %v62_v1 = vld [vmem:[%s209_s2] sm:$0xff]  ;;  %v26_v3 = vsel %vm25_vm0, %v24_v0, -inf }
   0x3   :  { %v17_v2 = vld [vmem:[%s207_s0] sm:$0xff] }
   0x4   :  { %8 = vsyncpa [#allocation3], 0  ;;  %27 = vmax.xlane.f32.xlu0 %v26_v3  ;;  %21 = vperm.xlu1 %122, %v17_v2   ;;  %v63_v5 = vsel %vm25_vm0, %v62_v1, -inf  ;;  %v18_v12 = vlaneseq  ;;  %v44_v21 = vsel %vm25_vm0, %v24_v0, 0.0  ;;  %v81_v24 = vsel %vm25_vm0, %v62_v1, 0.0  ;;  %s157_s18 = smov [#allocation2]  }
   0x5   :  { %vm50_vm2 = vcmask 7168   ;;  %s108_s19 = sshll.u32 %s157_s18, 4  ;;  %vm100_vm3 = vcmask 0   ;;  %s109_s19 = int_to_ptr.vmem [resolvable:$true] %s108_s19 }
   0x6   :  { %v19_v13 = vand.u32 127, %v18_v12  ;;  %s132_s21 = scalar_lea.vmem %s109_s19, 16  ;;  %s136_s22 = scalar_lea.vmem %s109_s19, 32 }
   0x7   :  { %p133_p0 = scmp.ne.s32.totalorder %s109_s19, %s132_s21  ;;  %p137_p1 = scmp.lt.s32.totalorder %s109_s19, %s109_s19 }
   0x8   :  { %64 = vmax.xlane.f32.xlu0 %v63_v5  ;;  %p138_p2 = scmp.lt.s32.totalorder %s136_s22, %s132_s21 }
   0xa   :  { %p139_p3 = por %p138_p2, %p137_p1 }
   0xc   :  { %p140_p4 = pnand %p139_p3, %p133_p0 }
  0x83   :  { %v22_v14 = vpop.permute.xlu1 %21 }
  0x84   :  { %vm23_vm1 = vcmp.eq.s32.totalorder %v19_v13, %v22_v14 }
  0x85   :  { %v37_v18 = vsel %vm23_vm1, %v24_v0, 0.0  ;;  %v74_v22 = vsel %vm23_vm1, %v62_v1, 0.0 }
  0x86   :  { %v38_v20 = vsel %vm25_vm0, %v37_v18, 0.0  ;;  %v75_v23 = vsel %vm25_vm0, %v74_v22, 0.0 }
  0x91   :  { %v28_v6 = vpop.xlane.xlu0 %27 }
  0x92   :  { %v29_v7 = vsub.f32 %v24_v0, %v28_v6 }
  0x94   :  { %v30_v8 = vmul.f32 1.442695, %v29_v7 }
  0x95   :  { %v65_v9 = vpop.xlane.xlu0 %64 }
  0x96   :  { %124 = vpow2.f32 %v30_v8  ;;  %v66_v10 = vsub.f32 %v62_v1, %v65_v9 }
  0x98   :  { %v67_v11 = vmul.f32 1.442695, %v66_v10 }
  0x9a   :  { %126 = vpow2.f32 %v67_v11 }
  0xa0   :  { %v125_v15 = vpop.eup %124 }
  0xa1   :  { %v32_v16 = vsel %vm25_vm0, %v125_v15, 0.0 }
  0xa2   :  { %33 = vadd.xlane.f32.xlu1 %v32_v16 }
  0xa4   :  { %v127_v17 = vpop.eup %126 }
  0xa5   :  { %v69_v19 = vsel %vm25_vm0, %v127_v17, 0.0 }
  0xa6   :  { %70 = vadd.xlane.f32.xlu0 %v69_v19 }
  0xaa   :  { %39 = vadd.xlane.f32.xlu0 %v38_v20 }
  0xae   :  { %45 = vadd.xlane.f32.xlu0 %v44_v21 }
  0xb2   :  { %76 = vadd.xlane.f32.xlu0 %v75_v23 }
  0xb6   :  { %82 = vadd.xlane.f32.xlu0 %v81_v24 }
 0x12f   :  { %v34_v25 = vpop.xlane.xlu1 %33 }
 0x130   :  { %128 = vlog2.f32 %v34_v25 }
 0x133   :  { %v71_v26 = vpop.xlane.xlu0 %70 }
 0x134   :  { %130 = vlog2.f32 %v71_v26 }
 0x137   :  { %v40_v27 = vpop.xlane.xlu0 %39 }
 0x138   :  { %v42_v33 = vmul.f32 0.9, %v40_v27 }
 0x13a   :  { %v129_v28 = vpop.eup %128 }
 0x13b   :  { %v36_v29 = vmul.f32 0.6931472, %v129_v28  ;;  %v46_v30 = vpop.xlane.xlu0 %45 }
 0x13c   :  { %v47_v31 = vmul.f32 0.03125, %v46_v30 }
 0x13d   :  { %v41_v32 = vadd.f32 %v36_v29, %v28_v6 }
 0x13e   :  { %v131_v34 = vpop.eup %130  ;;  %v48_v35 = vmul.f32 0.1, %v47_v31 }
 0x13f   :  { %v73_v36 = vmul.f32 0.6931472, %v131_v34  ;;  %v43_v37 = vsub.f32 %v41_v32, %v42_v33  ;;  %v77_v38 = vpop.xlane.xlu0 %76 }
 0x140   :  { %v79_v41 = vmul.f32 0.9, %v77_v38 }
 0x141   :  { %v49_v39 = vsub.f32 %v43_v37, %v48_v35  ;;  %v78_v40 = vadd.f32 %v73_v36, %v65_v9 }
 0x143   :  { %v83_v42 = vpop.xlane.xlu0 %82  ;;  %v51_v43 = vsel %vm50_vm2, %v49_v39, 0.0  ;;  %v80_v45 = vsub.f32 %v78_v40, %v79_v41 }
 0x144   :  { %v84_v44 = vmul.f32 0.03125, %v83_v42  ;;  %52 = vadd.xlane.f32.xlu0 %v51_v43 }
 0x146   :  { %v85_v46 = vmul.f32 0.1, %v84_v44 }
 0x148   :  { %v86_v47 = vsub.f32 %v80_v45, %v85_v46 }
 0x14a   :  { %v87_v48 = vsel %vm50_vm2, %v86_v47, 0.0 }
 0x14b   :  { %88 = vadd.xlane.f32.xlu0 %v87_v48 }
 0x1d1   :  { %v53_v49 = vpop.xlane.xlu0 %52 }
 0x1d2   :  { %v54_v50 = vrot.slane %v53_v49, 4 }
 0x1d4   :  { %v55_v51 = vadd.f32 %v54_v50, %v53_v49 }
 0x1d6   :  { %v56_v52 = vrot.slane %v55_v51, 2 }
 0x1d8   :  { %v89_v53 = vpop.xlane.xlu0 %88  ;;  %v57_v54 = vadd.f32 %v56_v52, %v55_v51 }
 0x1d9   :  { %v90_v55 = vrot.slane %v89_v53, 4 }
 0x1da   :  { %v58_v56 = vrot.slane %v57_v54, 1 }
 0x1db   :  { %v91_v57 = vadd.f32 %v90_v55, %v89_v53 }
 0x1dc   :  { %v59_v58 = vadd.f32 %v58_v56, %v57_v54 }
 0x1dd   :  { %v92_v59 = vrot.slane %v91_v57, 2 }
 0x1de   :  { %116 = vpush %v59_v58 }
 0x1df   :  { %v93_v60 = vadd.f32 %v92_v59, %v91_v57 }
 0x1e1   :  { %v94_v61 = vrot.slane %v93_v60, 1 }
 0x1e3   :  { %v95_v62 = vadd.f32 %v94_v61, %v93_v60 }
 0x1e5   :  { %118 = vpush %v95_v62 }
 0x20f   :  { %s117_s0 = spop %116 }
 0x216   :  { %s119_s1 = spop %118 }
 0x217   :  { %s97_s2 = smul.f32 0.4, %s119_s1 }
 0x219   :  { %s98_s20 = sadd.f32 %s117_s0, %s97_s2 }
 0x21b   :  { %v99_v63 = vstv %s98_s20 }
 0x21c   :  { %101 = vst.msk [vmem:[#allocation2] sm:$0x1] %vm100_vm3, %v99_v63 }
 0x21d   :  { %143 = shalt.err (!%p140_p4)
}
 0x21e   :  { %s144_s25 = scalar_lea.hbm %s210_s3, 16 }
 0x21f   :  { %p145_p5 = scmp.ne.s32.totalorder %s210_s3, %s144_s25  ;;  %p148_p6 = scmp.lt.u32.totalorder %s144_s25, %s210_s3 }
 0x221   :  { %p150_p7 = pnand %p148_p6, %p145_p5 }
 0x223   :  { %153 = shalt.err (!%p150_p7)
}
 0x224   :  { %111 = dma.vmem_to_hbm [thread:$0]  %s109_s19, 16, %s210_s3, [#allocation3]  }
 0x225   :  { %154 = dma.done.wait [#allocation3], 16  }
 0x226   :  { %155 = vsyncadd [#allocation3], 4294967280 }
 0x227   :  { %115 = vsyncpa [#allocation3], 1 }

</bundles_post_ra>
